<compile_context>
chip_gen: v7x
topology: tpu7x:2x2x1
jax: 0.10.0
libtpu: 0.0.40
codegen_flags: <defaults>
</compile_context>

<pallas_src>
import jax
import jax.numpy as jnp
from jax.experimental import pallas as pl
from jax.experimental.pallas import tpu as pltpu


def _dwsep_kernel(xp_ref, w_ref, shift_ref, o_ref):
    # xp_ref:    (1, H+2, W+2, Cin)    zero-padded input (resident per batch)
    # w_ref:     (9*Cin, Cout_pad)     fused dw*pw*bn_scale weights (bf16/f32)
    # shift_ref: (1, Cout_pad)         fused BN shift (f32)
    # o_ref:     (1, TH, W, Cout_pad)  lane-dense output row-block
    TH = o_ref.shape[1]
    W = o_ref.shape[2]
    cout_p = o_ref.shape[3]
    cin = xp_ref.shape[3]

    h = pl.program_id(1)
    row0 = pl.multiple_of(h * TH, TH)

    # im2col: 9 halo-shifted taps read directly from the VMEM ref.
    cols = []
    for kh in range(3):
        for kw in range(3):
            cols.append(xp_ref[0, pl.ds(row0 + kh, TH), pl.ds(kw, W), :])
    patches = jnp.concatenate(cols, axis=-1)            # (TH, W, 9*Cin)
    patches = patches.reshape(TH * W, 9 * cin).astype(w_ref.dtype)

    # Fused depthwise + pointwise + BN-scale as one MXU matmul (f32 accumulate).
    y = jnp.dot(patches, w_ref[...], preferred_element_type=jnp.float32)

    # BN shift + ReLU epilogue (f32 VPU), lane-dense store.
    y = jnp.maximum(y + shift_ref[...], 0.0)
    o_ref[...] = y.reshape(1, TH, W, cout_p).astype(o_ref.dtype)


def depthwise_separable_conv(x_nchw, dw_w, pw_w, gamma, beta, run_mean,
                             run_var, eps=1e-5, mxu_dtype=jnp.bfloat16):
    """Forward pass of DepthwiseSeparableConv (eval-mode BatchNorm).

    x_nchw: (N, Cin, H, W) f32; dw_w: (Cin,1,3,3); pw_w: (Cout,Cin,1,1)
    gamma/beta/run_mean/run_var: (Cout,).  Returns (N, Cout, H, W) f32.
    """
    N, Cin, H, W = x_nchw.shape
    Cout = pw_w.shape[0]
    Cout_pad = ((Cout + 127) // 128) * 128               # lane-dense output

    # Row-tile height: small divisor of H -> more grid steps, small out block.
    TH = H
    for cand in (8, 16, 32):
        if H % cand == 0:
            TH = cand
            break
    HT = H // TH

    # NCHW -> NHWC; zero-pad spatially (padding=1).
    x = jnp.transpose(x_nchw, (0, 2, 3, 1))
    xp = jnp.pad(x, ((0, 0), (1, 1), (1, 1), (0, 0)))

    # Fold depthwise, pointwise and BN scale into one (9*Cin, Cout_pad) matrix.
    dw_hwc = jnp.transpose(dw_w[:, 0, :, :], (1, 2, 0))             # (3,3,Cin)
    pw_mat = jnp.transpose(pw_w[:, :, 0, 0], (1, 0))                # (Cin,Cout)
    scale = gamma / jnp.sqrt(run_var + eps)                         # (Cout,)
    shift = beta - run_mean * scale                                 # (Cout,)
    w_comb = dw_hwc[:, :, :, None] * pw_mat[None, None, :, :]       # (3,3,Cin,Cout)
    w_comb = (w_comb * scale[None, None, None, :]).reshape(9 * Cin, Cout)
    w_comb = jnp.pad(w_comb, ((0, 0), (0, Cout_pad - Cout))).astype(mxu_dtype)
    shift_p = jnp.pad(shift, (0, Cout_pad - Cout)).reshape(1, Cout_pad)
    shift_p = shift_p.astype(jnp.float32)

    # Explicit VMEM budget: double-buffered blocks + weights + headroom.
    in_bytes = (H + 2) * (W + 2) * Cin * 4
    out_bytes = TH * W * Cout_pad * 4
    w_bytes = 9 * Cin * Cout_pad * jnp.dtype(mxu_dtype).itemsize + Cout_pad * 4
    vmem_limit = int(min(32 << 20,
                         max(16 << 20,
                             2 * (in_bytes + out_bytes + w_bytes) + (2 << 20))))

    out_nhwc = pl.pallas_call(
        _dwsep_kernel,
        out_shape=jax.ShapeDtypeStruct((N, H, W, Cout_pad), jnp.float32),
        grid_spec=pltpu.PrefetchScalarGridSpec(
            num_scalar_prefetch=0,
            grid=(N, HT),
            in_specs=[
                # Whole padded image stays resident across the inner H-tile axis
                # (block index does not change with h -> no re-DMA).
                pl.BlockSpec((1, H + 2, W + 2, Cin), lambda n, h: (n, 0, 0, 0)),
                pl.BlockSpec((9 * Cin, Cout_pad), lambda n, h: (0, 0)),
                pl.BlockSpec((1, Cout_pad), lambda n, h: (0, 0)),
            ],
            out_specs=pl.BlockSpec((1, TH, W, Cout_pad),
                                   lambda n, h: (n, h, 0, 0)),
        ),
        compiler_params=pltpu.CompilerParams(
            dimension_semantics=("parallel", "parallel"),
            vmem_limit_bytes=vmem_limit),
    )(xp, w_comb, shift_p)

    # Strip channel padding, back to NCHW.
    return jnp.transpose(out_nhwc[..., :Cout], (0, 3, 1, 2))


def _reference(x_nchw, dw_w, pw_w, gamma, beta, run_mean, run_var, eps=1e-5):
    """Pure-JAX f32 reference (mirrors PyTorch eval-mode semantics)."""
    dn = jax.lax.conv_dimension_numbers(x_nchw.shape, dw_w.shape,
                                        ("NCHW", "OIHW", "NCHW"))
    y = jax.lax.conv_general_dilated(
        x_nchw, dw_w, window_strides=(1, 1), padding=((1, 1), (1, 1)),
        dimension_numbers=dn, feature_group_count=x_nchw.shape[1])
    dn2 = jax.lax.conv_dimension_numbers(y.shape, pw_w.shape,
                                         ("NCHW", "OIHW", "NCHW"))
    y = jax.lax.conv_general_dilated(
        y, pw_w, window_strides=(1, 1), padding=((0, 0), (0, 0)),
        dimension_numbers=dn2)
    scale = (gamma / jnp.sqrt(run_var + eps)).reshape(1, -1, 1, 1)
    shift = (beta - run_mean * gamma / jnp.sqrt(run_var + eps)).reshape(1, -1, 1, 1)
    return jnp.maximum(y * scale + shift, 0.0)


if __name__ == "__main__":
    N, Cin, Cout, H, W = 2, 4, 8, 16, 16

    key = jax.random.PRNGKey(0)
    kx, kdw, kpw, kg, kb, km, kv = jax.random.split(key, 7)

    x = jax.random.normal(kx, (N, Cin, H, W), jnp.float32)
    dw_w = jax.random.normal(kdw, (Cin, 1, 3, 3), jnp.float32) * 0.2
    pw_w = jax.random.normal(kpw, (Cout, Cin, 1, 1), jnp.float32) * 0.2
    gamma = 1.0 + 0.1 * jax.random.normal(kg, (Cout,), jnp.float32)
    beta = 0.1 * jax.random.normal(kb, (Cout,), jnp.float32)
    run_mean = 0.1 * jax.random.normal(km, (Cout,), jnp.float32)
    run_var = jnp.abs(1.0 + 0.1 * jax.random.normal(kv, (Cout,), jnp.float32))

    out = depthwise_separable_conv(x, dw_w, pw_w, gamma, beta,
                                   run_mean, run_var)
    out = jax.block_until_ready(out)

    ref = _reference(x, dw_w, pw_w, gamma, beta, run_mean, run_var)
    assert out.shape == (N, Cout, H, W)
    # bf16 MXU operands (f32 accumulation) -> loosened tolerance vs f32 ref.
    assert jnp.allclose(out, ref, atol=2e-2, rtol=2e-2), "mismatch vs reference"

    print("KERNEL_OK")
</pallas_src>

<mosaic_0001>
module attributes {stable_mosaic.version = 11 : i64} {
  func.func @_dwsep_kernel(%arg0: i32, %arg1: i32, %arg2: memref<1x18x18x4xf32, #tpu.memory_space<vmem>>, %arg3: memref<36x128xbf16, #tpu.memory_space<vmem>>, %arg4: memref<1x128xf32, #tpu.memory_space<vmem>>, %arg5: memref<1x8x16x128xf32, #tpu.memory_space<vmem>>) attributes {dimension_semantics = [#tpu.dimension_semantics<parallel>, #tpu.dimension_semantics<parallel>], iteration_bounds = array<i64: 2, 2>, scalar_prefetch = 0 : i64, scratch_operands = 0 : i64, tpu.core_type = #tpu.core_type<tc>, window_params = [{transform_indices = @transform_0, window_bounds = array<i64: 1, 18, 18, 4>}, {pipeline_mode = #tpu.pipeline_mode<synchronous>, transform_indices = @transform_1, window_bounds = array<i64: 36, 128>}, {pipeline_mode = #tpu.pipeline_mode<synchronous>, transform_indices = @transform_2, window_bounds = array<i64: 1, 128>}, {transform_indices = @transform_3, window_bounds = array<i64: 1, 8, 16, 128>}]} {
    %c8_i32 = arith.constant 8 : i32
    %0 = arith.muli %arg1, %c8_i32 : i32
    %1 = tpu.assume_multiple %0, 8 : i32
    %c0_i32 = arith.constant 0 : i32
    %2 = arith.addi %1, %c0_i32 : i32
    %c0 = arith.constant 0 : index
    %3 = arith.index_cast %2 : i32 to index
    %c0_0 = arith.constant 0 : index
    %c0_1 = arith.constant 0 : index
    %4 = vector.load %arg2[%c0, %3, %c0_0, %c0_1] : memref<1x18x18x4xf32, #tpu.memory_space<vmem>>, vector<1x8x16x4xf32>
    %5 = vector.shape_cast %4 : vector<1x8x16x4xf32> to vector<8x16x4xf32>
    %c0_i32_2 = arith.constant 0 : i32
    %6 = arith.addi %1, %c0_i32_2 : i32
    %c0_3 = arith.constant 0 : index
    %7 = arith.index_cast %6 : i32 to index
    %c1 = arith.constant 1 : index
    %c0_4 = arith.constant 0 : index
    %8 = vector.load %arg2[%c0_3, %7, %c1, %c0_4] : memref<1x18x18x4xf32, #tpu.memory_space<vmem>>, vector<1x8x16x4xf32>
    %9 = vector.shape_cast %8 : vector<1x8x16x4xf32> to vector<8x16x4xf32>
    %c0_i32_5 = arith.constant 0 : i32
    %10 = arith.addi %1, %c0_i32_5 : i32
    %c0_6 = arith.constant 0 : index
    %11 = arith.index_cast %10 : i32 to index
    %c2 = arith.constant 2 : index
    %c0_7 = arith.constant 0 : index
    %12 = vector.load %arg2[%c0_6, %11, %c2, %c0_7] : memref<1x18x18x4xf32, #tpu.memory_space<vmem>>, vector<1x8x16x4xf32>
    %13 = vector.shape_cast %12 : vector<1x8x16x4xf32> to vector<8x16x4xf32>
    %c1_i32 = arith.constant 1 : i32
    %14 = arith.addi %1, %c1_i32 : i32
    %c0_8 = arith.constant 0 : index
    %15 = arith.index_cast %14 : i32 to index
    %c0_9 = arith.constant 0 : index
    %c0_10 = arith.constant 0 : index
    %16 = vector.load %arg2[%c0_8, %15, %c0_9, %c0_10] : memref<1x18x18x4xf32, #tpu.memory_space<vmem>>, vector<1x8x16x4xf32>
    %17 = vector.shape_cast %16 : vector<1x8x16x4xf32> to vector<8x16x4xf32>
    %c1_i32_11 = arith.constant 1 : i32
    %18 = arith.addi %1, %c1_i32_11 : i32
    %c0_12 = arith.constant 0 : index
    %19 = arith.index_cast %18 : i32 to index
    %c1_13 = arith.constant 1 : index
    %c0_14 = arith.constant 0 : index
    %20 = vector.load %arg2[%c0_12, %19, %c1_13, %c0_14] : memref<1x18x18x4xf32, #tpu.memory_space<vmem>>, vector<1x8x16x4xf32>
    %21 = vector.shape_cast %20 : vector<1x8x16x4xf32> to vector<8x16x4xf32>
    %c1_i32_15 = arith.constant 1 : i32
    %22 = arith.addi %1, %c1_i32_15 : i32
    %c0_16 = arith.constant 0 : index
    %23 = arith.index_cast %22 : i32 to index
    %c2_17 = arith.constant 2 : index
    %c0_18 = arith.constant 0 : index
    %24 = vector.load %arg2[%c0_16, %23, %c2_17, %c0_18] : memref<1x18x18x4xf32, #tpu.memory_space<vmem>>, vector<1x8x16x4xf32>
    %25 = vector.shape_cast %24 : vector<1x8x16x4xf32> to vector<8x16x4xf32>
    %c2_i32 = arith.constant 2 : i32
    %26 = arith.addi %1, %c2_i32 : i32
    %c0_19 = arith.constant 0 : index
    %27 = arith.index_cast %26 : i32 to index
    %c0_20 = arith.constant 0 : index
    %c0_21 = arith.constant 0 : index
    %28 = vector.load %arg2[%c0_19, %27, %c0_20, %c0_21] : memref<1x18x18x4xf32, #tpu.memory_space<vmem>>, vector<1x8x16x4xf32>
    %29 = vector.shape_cast %28 : vector<1x8x16x4xf32> to vector<8x16x4xf32>
    %c2_i32_22 = arith.constant 2 : i32
    %30 = arith.addi %1, %c2_i32_22 : i32
    %c0_23 = arith.constant 0 : index
    %31 = arith.index_cast %30 : i32 to index
    %c1_24 = arith.constant 1 : index
    %c0_25 = arith.constant 0 : index
    %32 = vector.load %arg2[%c0_23, %31, %c1_24, %c0_25] : memref<1x18x18x4xf32, #tpu.memory_space<vmem>>, vector<1x8x16x4xf32>
    %33 = vector.shape_cast %32 : vector<1x8x16x4xf32> to vector<8x16x4xf32>
    %c2_i32_26 = arith.constant 2 : i32
    %34 = arith.addi %1, %c2_i32_26 : i32
    %c0_27 = arith.constant 0 : index
    %35 = arith.index_cast %34 : i32 to index
    %c2_28 = arith.constant 2 : index
    %c0_29 = arith.constant 0 : index
    %36 = vector.load %arg2[%c0_27, %35, %c2_28, %c0_29] : memref<1x18x18x4xf32, #tpu.memory_space<vmem>>, vector<1x8x16x4xf32>
    %37 = vector.shape_cast %36 : vector<1x8x16x4xf32> to vector<8x16x4xf32>
    %38 = tpu.concatenate %5, %9, %13, %17, %21, %25, %29, %33, %37 in 2 : vector<8x16x4xf32>, vector<8x16x4xf32>, vector<8x16x4xf32>, vector<8x16x4xf32>, vector<8x16x4xf32>, vector<8x16x4xf32>, vector<8x16x4xf32>, vector<8x16x4xf32>, vector<8x16x4xf32> -> vector<8x16x36xf32>
    %39 = vector.shape_cast %38 : vector<8x16x36xf32> to vector<128x36xf32>
    %40 = arith.truncf %39 : vector<128x36xf32> to vector<128x36xbf16>
    %c0_30 = arith.constant 0 : index
    %c0_31 = arith.constant 0 : index
    %41 = vector.load %arg3[%c0_30, %c0_31] : memref<36x128xbf16, #tpu.memory_space<vmem>>, vector<36x128xbf16>
    %cst = arith.constant dense<0.000000e+00> : vector<128x128xf32>
    %42 = tpu.matmul %40, %41, %cst {dimension_numbers = #tpu.dot_dimension_numbers<[1], [0], [0], [1], [0, 0, 1, 1], [], []>} : vector<128x36xbf16>, vector<36x128xbf16>, vector<128x128xf32> -> vector<128x128xf32>
    %c0_32 = arith.constant 0 : index
    %c0_33 = arith.constant 0 : index
    %43 = vector.load %arg4[%c0_32, %c0_33] : memref<1x128xf32, #tpu.memory_space<vmem>>, vector<1x128xf32>
    %44 = vector.broadcast %43 : vector<1x128xf32> to vector<128x128xf32>
    %45 = arith.addf %42, %44 : vector<128x128xf32>
    %cst_34 = arith.constant 0.000000e+00 : f32
    %46 = vector.broadcast %cst_34 : f32 to vector<128x128xf32>
    %47 = arith.maximumf %45, %46 : vector<128x128xf32>
    %48 = vector.shape_cast %47 : vector<128x128xf32> to vector<1x8x16x128xf32>
    %c0_35 = arith.constant 0 : index
    %c0_36 = arith.constant 0 : index
    %c0_37 = arith.constant 0 : index
    %c0_38 = arith.constant 0 : index
    %49 = vector.load %arg5[%c0_35, %c0_36, %c0_37, %c0_38] : memref<1x8x16x128xf32, #tpu.memory_space<vmem>>, vector<1x8x16x128xf32>
    tpu.vector_store %arg5[%c0_35, %c0_36, %c0_37, %c0_38], %48 {strides = array<i32>} : memref<1x8x16x128xf32, #tpu.memory_space<vmem>>, vector<1x8x16x128xf32>,
    return
  }
  func.func @transform_0(%arg0: i32, %arg1: i32) -> (i32, i32, i32, i32) {
    %c0_i32 = arith.constant 0 : i32
    %c0_i32_0 = arith.constant 0 : i32
    %c0_i32_1 = arith.constant 0 : i32
    %c0_i32_2 = arith.constant 0 : i32
    return %arg0, %c0_i32, %c0_i32_0, %c0_i32_1 : i32, i32, i32, i32
  }
  func.func @transform_1(%arg0: i32, %arg1: i32) -> (i32, i32) {
    %c0_i32 = arith.constant 0 : i32
    %c0_i32_0 = arith.constant 0 : i32
    %c0_i32_1 = arith.constant 0 : i32
    return %c0_i32, %c0_i32_0 : i32, i32
  }
  func.func @transform_2(%arg0: i32, %arg1: i32) -> (i32, i32) {
    %c0_i32 = arith.constant 0 : i32
    %c0_i32_0 = arith.constant 0 : i32
    %c0_i32_1 = arith.constant 0 : i32
    return %c0_i32, %c0_i32_0 : i32, i32
  }
  func.func @transform_3(%arg0: i32, %arg1: i32) -> (i32, i32, i32, i32) {
    %c0_i32 = arith.constant 0 : i32
    %c0_i32_0 = arith.constant 0 : i32
    %c0_i32_1 = arith.constant 0 : i32
    return %arg0, %arg1, %c0_i32, %c0_i32_0 : i32, i32, i32, i32
  }
}

</mosaic_0001>

<bundles_post_ra>
// kernel: tpu_custom_call.1
= control target key start
LH: loop header
LB: loop body
LE: loop exit
PB: predicated region body
PF: predicated region fallthrough
CT: control target
= control target key end

     0   :  { %8 = vsyncpa [#allocation3], 0  ;;  %s2637_s0 = inlined_call_operand.vmem [shape: f32[2,18,18,4], index: 0, kind: input, shape index: {}]   ;;  %s2638_s1 = inlined_call_operand.vmem [shape: bf16[36,128], index: 1, kind: input, shape index: {}]   ;;  %s2639_s2 = inlined_call_operand.vmem [shape: f32[1,128], index: 2, kind: input, shape index: {}]   ;;  %s2640_s3 = inlined_call_operand.hbm [shape: f32[2,16,16,128], index: 3, kind: output, shape index: {}]  }
   0x1   :  { %10 = vsyncpa [#allocation3 + $0x1], 0  ;;  %s1982_s12 = smov 0   ;;  %s1984_s13 = smov 0  }
   0x2   :  { %s1986_s14 = smov 0   ;;  %s1988_s15 = smov 0  }
   0x3   :  { %s1990_s16 = smov 0   ;;  %s1992_s17 = smov 0  }
   0x4   :  { %s1994_s18 = smov 0   ;;  %s1996_s19 = smov 0  }
   0x5 LB: > { %s1282_s20 = sadd.s32 4294967295, %s1950_s19   ;;  %s1283_s21 = sadd.s32 4294967294, %s1950_s19   ;;  %s1950_s19 = sphi %s1996_s19, %s16_s19   ;;  %s1946_s18 = sphi %s1994_s18, %s2649_s18   ;;  %s1942_s17 = sphi %s1992_s17, %s2648_s17   ;;  %s1938_s16 = sphi %s1990_s16, %s2647_s16   ;;  %s1934_s15 = sphi %s1988_s15, %s2646_s15   ;;  %s1930_s14 = sphi %s1986_s14, %s2645_s14   ;;  %s1926_s13 = sphi %s1984_s13, %s2644_s13   ;;  %s1922_s12 = sphi %s1982_s12, %s2643_s12  }
   0x6   : > { %s25_s22 = sadd.s32 1, %s1942_s17  ;;  %s28_s23 = sadd.s32 1, %s1946_s18 }
   0x7   : > { %p26_p0 = scmp.ge.s32.totalorder %s25_s22, 2  ;;  %p115_p1 = scmp.ne.s32.totalorder %s1930_s14, %s1926_s13 }
   0x8   : > { %p116_p2 = scmp.eq.s32.totalorder %s1282_s20, 3  ;;  %p121_p5 = scmp.ne.s32.totalorder %s1926_s13, %s1922_s12 }
   0x9   : > { %s2651_s22 = smov (%p26_p0, %s25_s22), 0  ;;  %s2653_s23 = smov (!%p26_p0, %s28_s23), %s1946_s18 }
   0xa   : > { %s101_s24 = ssub.s32 %s1942_s17, %s2651_s22  ;;  %p2033_p3 = por %p116_p2, %p115_p1 }
   0xb   : > { %p30_p4 = scmp.ge.s32.totalorder %s2653_s23, 2  ;;  %p122_p6 = scmp.eq.s32.totalorder %s1283_s21, 3 }
   0xc   : > { %p1286_p7 = scmp.ge.s32.totalorder %s1950_s19, 1  ;;  %p154_p9 = scmp.lt.s32.totalorder %s1950_s19, 5 }
   0xd   : > { %s2655_s23 = smov (%p30_p4, %s2653_s23), 0  ;;  %p2042_p8 = por %p122_p6, %p121_p5 }
   0xe   : > { %s100_s27 = ssub.s32 %s1946_s18, %s2655_s23  ;;  %s105_s28 = sadd.s32 1, %s1930_s14 }
   0xf   : > { %s102_s29 = sor.u32 %s101_s24, %s100_s27  ;;  %p155_p10 = pnand %p1286_p7, %p154_p9 }
  0x10   : > { %p103_p11 = scmp.eq.s32.totalorder %s102_s29, 0  ;;  %p178_p12 = scmp.lt.s32.totalorder (!%p155_p10), %s1938_s16, 1  ;;  %v1853_v54 = vld [vmem:[%s2638_s1] sm:$0xff] (!%p155_p10)   ;;  %v1854_v59 = vld [vmem:[%s2638_s1 + $0x8] sm:$0xff] (!%p155_p10)   ;;  %vm1046_vm0 = vcmask (!%p155_p10), 1041408   ;;  %vm850_vm1 = vcmask (!%p155_p10), 31744  }
  0x11   : > { %158 = sbr.rel (%p155_p10) target bundleno = 512 (0x200), region = 32  ;;  %s1952_s11 = smov (!%p155_p10), 4   ;;  %1422 = vmatprep.subr.bf16.mxu0 (!%p155_p10), %v1853_v54  ;;  %1444 = vmatprep.subr.bf16.mxu1 (!%p155_p10), %v1853_v54  ;;  %v1855_v62 = vld [vmem:[%s2638_s1 + $0x10] ss:$0 sps:$4 sm:$0x33] (!%p155_p10)   ;;  %vm867_vm2 = vcmask (!%p155_p10), 64512  }
  0x12   : > { %s2051_s30 = scalar_select %p103_p11, %s1930_s14, %s105_s28  }
  0x13   : > { %s1290_s5 = smul.u32 (!%p155_p10), 192, %s1934_s15  ;;  %s1953_s20 = smov (!%p155_p10), 8   ;;  %1423 = vmatpush3.bf16.msra.mxu0 (!%p155_p10), %v1853_v54  ;;  %1447 = vmatpush3.bf16.msra.mxu1 (!%p155_p10), %v1853_v54  ;;  %v1048_v63 = vsel (!%p155_p10), %vm1046_vm0, %v1855_v62, 0  ;;  %vm884_vm3 = vcmask (!%p155_p10), 97280   ;;  %vm901_vm4 = vcmask (!%p155_p10), 130048   ;;  %vm918_vm5 = vcmask (!%p155_p10), 162816  }
  0x14   : > { %s1954_s21 = smov (!%p155_p10), 12   ;;  %s1955_s24 = smov (!%p155_p10), 16   ;;  %1424 = vmatprep.subr.bf16.mxu0 (!%p155_p10), %v1854_v59  ;;  %1445 = vmatprep.subr.bf16.mxu1 (!%p155_p10), %v1854_v59  ;;  %vm935_vm6 = vcmask (!%p155_p10), 195584   ;;  %vm952_vm7 = vcmask (!%p155_p10), 228352   ;;  %vm969_vm8 = vcmask (!%p155_p10), 261120   ;;  %vm1021_vm9 = vcmask (!%p155_p10), 293888  }
  0x15   : > { %s1956_s27 = smov (!%p155_p10), 20   ;;  %s1957_s28 = smov (!%p155_p10), 24  }
  0x16   : > { %s1958_s7 = smov (!%p155_p10), 28   ;;  %s1959_s29 = smov (!%p155_p10), 32  }
  0x17   : > { %1425 = vmatpush3.bf16.msra.mxu0 (!%p155_p10), %v1854_v59  ;;  %1448 = vmatpush3.bf16.msra.mxu1 (!%p155_p10), %v1854_v59 }
  0x18   : > { %s179_s4 = scalar_select %p178_p12, %s1938_s16, 1  ;;  %1450 = vmatprep.subr.msk.bf16.mxu0 %vm1046_vm0, %v1855_v62  ;;  %1451 = vmatprep.subr.msk.bf16.mxu1 %vm1046_vm0, %v1855_v62 }
  0x1a   : > { %s1452_s6 = smul.u32 432, %s179_s4  ;;  %s1406_s4 = sshll.u32 %s1938_s16, 5 }
  0x1b   : > { %1427 = vmatpush3.bf16.msra.mxu0 %v1048_v63  ;;  %1449 = vmatpush3.bf16.msra.mxu1 %v1048_v63 }
  0x1c   : > { %s182_s9 = scalar_lea.vmem %s2637_s0, %s1452_s6 }
  0x1d   : > { %s2059_s10 = scalar_lea.vmem %s182_s9, %s1290_s5 }
  0x1e   : > { %v206_v0 = vld [vmem:[%s2059_s10 + $0x19] sm:$0xff]  ;;  %v207_v1 = vld [vmem:[%s2059_s10 + $0x21] sm:$0xff]  ;;  %v205_v4 = vld [vmem:[%s2059_s10 + $0x9] sm:$0xff] }
  0x1f   : > { %v204_v2 = vld [vmem:[%s2059_s10 + $0x1] sm:$0xff]  ;;  %v1543_v3 = vpack.i.bf16 %v207_v1, %v206_v0  ;;  %v214_v5 = vld [vmem:[%s2059_s10 + $0x79] sm:$0xff]  ;;  %v213_v9 = vld [vmem:[%s2059_s10 + $0x69] sm:$0xff] }
  0x20   : > { %v215_v6 = vld [vmem:[%s2059_s10 + $0x81] sm:$0xff]  ;;  %v1533_v7 = vpack.i.bf16 %v205_v4, %v204_v2  ;;  %v229_v13 = vld [vmem:[%s2059_s10 + $0x6a] sm:$0xff]  ;;  %v2095_v24 = vld [vmem:[%s2059_s10 + $0x78] sm:$0xff] }
  0x21   : > { %v212_v8 = vld [vmem:[%s2059_s10 + $0x61] sm:$0xff]  ;;  %1544 = vrot.lane.b32.xlu1 %v1543_v3, %s1952_s11  ;;  %v2070_v10 = vpack.i.bf16 %v215_v6, %v214_v5  ;;  %v221_v15 = vld [vmem:[%s2059_s10 + $0xa] sm:$0xff]  ;;  %v2101_v26 = vld [vmem:[%s2059_s10 + $0x18] sm:$0xff] }
  0x22   : > { %1534 = vrot.lane.b32.xlu0 %v1533_v7, %s1952_s11  ;;  %v2073_v11 = vpack.i.bf16 %v213_v9, %v212_v8  ;;  %v228_v12 = vld [vmem:[%s2059_s10 + $0x62] sm:$0xff]  ;;  %v230_v18 = vld [vmem:[%s2059_s10 + $0x7a] sm:$0xff]  ;;  %v2116_v30 = vld [vmem:[%s2059_s10 + $0x90] sm:$0xff] }
  0x23   : > { %v220_v14 = vld [vmem:[%s2059_s10 + $0x2] sm:$0xff]  ;;  %v2081_v16 = vpack.i.bf16 %v229_v13, %v228_v12  ;;  %v222_v20 = vld [vmem:[%s2059_s10 + $0x1a] sm:$0xff]  ;;  %v2122_v32 = vld [vmem:[%s2059_s10 + $0x30] sm:$0xff] }
  0x24   : > { %v1553_v17 = vpack.i.bf16 %v221_v15, %v220_v14  ;;  %v231_v19 = vld [vmem:[%s2059_s10 + $0x82] sm:$0xff]  ;;  %v2119_v31 = vld [vmem:[%s2059_s10 + $0x98] sm:$0xff]  ;;  %v2158_v49 = vld [vmem:[%s2059_s10 + $0xb0] sm:$0xff] }
  0x25   : > { %1549 = vrot.lane.b32.xlu1 %v2070_v10, %s1952_s11  ;;  %v223_v21 = vld [vmem:[%s2059_s10 + $0x22] sm:$0xff]  ;;  %v2091_v22 = vpack.i.bf16 %v231_v19, %v230_v18  ;;  %v2125_v33 = vld [vmem:[%s2059_s10 + $0x38] sm:$0xff]  ;;  %v1588_v34 = vpack.i.bf16 %v2119_v31, %v2116_v30  ;;  %v2164_v51 = vld [vmem:[%s2059_s10 + $0x50] sm:$0xff] }
  0x26   : > { %1539 = vrot.lane.b32.xlu0 %v2073_v11, %s1952_s11  ;;  %v1563_v23 = vpack.i.bf16 %v223_v21, %v222_v20  ;;  %v2098_v25 = vld [vmem:[%s2059_s10 + $0x80] sm:$0xff]  ;;  %v1583_v35 = vpack.i.bf16 %v2125_v33, %v2122_v32  ;;  %v1319_v36 = vld [vmem:[%s2059_s10 + $0x91] sm:$0xff]  ;;  %v2155_v48 = vld [vmem:[%s2059_s10 + $0xa8] sm:$0xff] }
  0x27   : > { %v2104_v27 = vld [vmem:[%s2059_s10 + $0x20] sm:$0xff]  ;;  %v2110_v28 = vpack.i.bf16 %v2098_v25, %v2095_v24  ;;  %v1311_v38 = vld [vmem:[%s2059_s10 + $0x31] sm:$0xff]  ;;  %v2161_v50 = vld [vmem:[%s2059_s10 + $0x48] sm:$0xff]  ;;  %v1648_v52 = vpack.i.bf16 %v2158_v49, %v2155_v48 }
  0x28   : > { %v1573_v29 = vpack.i.bf16 %v2104_v27, %v2101_v26  ;;  %v1320_v37 = vld [vmem:[%s2059_s10 + $0x99] sm:$0xff]  ;;  %v1643_v53 = vpack.i.bf16 %v2164_v51, %v2161_v50  ;;  %v1369_v55 = vld [vmem:[%s2059_s10 + $0xa9] sm:$0xff]  ;;  %v1370_v56 = vld [vmem:[%s2059_s10 + $0xb1] sm:$0xff] }
  0x29   : > { %1559 = vrot.lane.b32.xlu1 %v2081_v16, %s1953_s20  ;;  %v1312_v39 = vld [vmem:[%s2059_s10 + $0x39] sm:$0xff]  ;;  %v1608_v40 = vpack.i.bf16 %v1320_v37, %v1319_v36  ;;  %v1361_v57 = vld [vmem:[%s2059_s10 + $0x49] sm:$0xff]  ;;  %v1362_v58 = vld [vmem:[%s2059_s10 + $0x51] sm:$0xff]  ;;  %v1668_v60 = vpack.i.bf16 %v1370_v56, %v1369_v55 }
  0x2a   : > { %1554 = vrot.lane.b32.xlu0 %v1553_v17, %s1953_s20  ;;  %v1603_v41 = vpack.i.bf16 %v1312_v39, %v1311_v38  ;;  %v1335_v42 = vld [vmem:[%s2059_s10 + $0x92] sm:$0xff]  ;;  %v1336_v43 = vld [vmem:[%s2059_s10 + $0x9a] sm:$0xff]  ;;  %v1663_v61 = vpack.i.bf16 %v1362_v58, %v1361_v57  ;;  %v1385_v0 = vld [vmem:[%s2059_s10 + $0xaa] sm:$0xff] }
  0x2b   : > { %v1327_v44 = vld [vmem:[%s2059_s10 + $0x32] sm:$0xff]  ;;  %v1328_v45 = vld [vmem:[%s2059_s10 + $0x3a] sm:$0xff]  ;;  %v1628_v46 = vpack.i.bf16 %v1336_v43, %v1335_v42  ;;  %v1377_v2 = vld [vmem:[%s2059_s10 + $0x4a] sm:$0xff] }
  0x2c   : > { %v1623_v47 = vpack.i.bf16 %v1328_v45, %v1327_v44  ;;  %v1386_v1 = vld [vmem:[%s2059_s10 + $0xb2] sm:$0xff]  ;;  %v1307_v6 = vld [vmem:[%s2059_s10 + $0xc0] sm:$0xff]  ;;  %v1308_v7 = vld [vmem:[%s2059_s10 + $0xc8] sm:$0xff] }
  0x2d   : > { %1569 = vrot.lane.b32.xlu1 %v2091_v22, %s1953_s20  ;;  %v1698_v4 = vpack.i.bf16 %v1386_v1, %v1385_v0  ;;  %v2210_v8 = vld [vmem:[%s2059_s10 + $0x60] sm:$0xff]  ;;  %v2213_v9 = vld [vmem:[%s2059_s10 + $0x68] sm:$0xff]  ;;  %v1748_v12 = vpack.i.bf16 %v1308_v7, %v1307_v6  ;;  %v1357_v21 = vld [vmem:[%s2059_s10 + $0xd8] sm:$0xff] }
  0x2e   : > { %1564 = vrot.lane.b32.xlu0 %v1563_v23, %s1953_s20  ;;  %v1743_v13 = vpack.i.bf16 %v2213_v9, %v2210_v8  ;;  %v1323_v14 = vld [vmem:[%s2059_s10 + $0xc1] sm:$0xff]  ;;  %v1324_v15 = vld [vmem:[%s2059_s10 + $0xc9] sm:$0xff] }
  0x2f   : > { %v1768_v17 = vpack.i.bf16 %v1324_v15, %v1323_v14  ;;  %v1339_v18 = vld [vmem:[%s2059_s10 + $0xc2] sm:$0xff]  ;;  %v1340_v19 = vld [vmem:[%s2059_s10 + $0xca] sm:$0xff]  ;;  %v1389_v39 = vld [vmem:[%s2059_s10 + $0xda] sm:$0xff] }
  0x30   : > { %v1788_v20 = vpack.i.bf16 %v1340_v19, %v1339_v18  ;;  %v189_v62 = vld [vmem:[%s2059_s10 + $0x8] sm:$0xff] }
  0x31   : > { %1579 = vrot.lane.b32.xlu1 %v2110_v28, %s1954_s21 }
  0x32   : > { %1574 = vrot.lane.b32.xlu0 %v1573_v29, %s1954_s21 }
  0x35   : > { %1589 = vrot.lane.b32.xlu1 %v1588_v34, %s1954_s21 }
  0x36   : > { %1584 = vrot.lane.b32.xlu0 %v1583_v35, %s1954_s21 }
  0x39   : > { %1599 = vrot.lane.b32.xlu1 %v2070_v10, %s1955_s24 }
  0x3a   : > { %1594 = vrot.lane.b32.xlu0 %v1543_v3, %s1955_s24  ;;  %v1378_v3 = vld [vmem:[%s2059_s10 + $0x52] sm:$0xff] }
  0x3b   : > { %v1693_v5 = vpack.i.bf16 %v1378_v3, %v1377_v2 }
  0x3d   : > { %1609 = vrot.lane.b32.xlu1 %v1608_v40, %s1955_s24 }
  0x3e   : > { %1604 = vrot.lane.b32.xlu0 %v1603_v41, %s1955_s24 }
  0x41   : > { %1619 = vrot.lane.b32.xlu1 %v2091_v22, %s1956_s27 }
  0x42   : > { %1614 = vrot.lane.b32.xlu0 %v1563_v23, %s1956_s27  ;;  %v1358_v23 = vld [vmem:[%s2059_s10 + $0xe0] sm:$0xff] }
  0x43   : > { %v1808_v29 = vpack.i.bf16 %v1358_v23, %v1357_v21 }
  0x45   : > { %1629 = vrot.lane.b32.xlu1 %v1628_v46, %s1956_s27 }
  0x46   : > { %1624 = vrot.lane.b32.xlu0 %v1623_v47, %s1956_s27 }
  0x49   : > { %1639 = vrot.lane.b32.xlu1 %v1588_v34, %s1957_s28  ;;  %v1373_v34 = vld [vmem:[%s2059_s10 + $0xd9] sm:$0xff] }
  0x4a   : > { %1634 = vrot.lane.b32.xlu0 %v1583_v35, %s1957_s28  ;;  %v1374_v35 = vld [vmem:[%s2059_s10 + $0xe1] sm:$0xff] }
  0x4b   : > { %v1828_v36 = vpack.i.bf16 %v1374_v35, %v1373_v34 }
  0x4d   : > { %1649 = vrot.lane.b32.xlu1 %v1648_v52, %s1957_s28 }
  0x4e   : > { %1644 = vrot.lane.b32.xlu0 %v1643_v53, %s1957_s28 }
  0x51   : > { %1659 = vrot.lane.b32.xlu1 %v1608_v40, %s1958_s7 }
  0x52   : > { %1654 = vrot.lane.b32.xlu0 %v1603_v41, %s1958_s7 }
  0x55   : > { %1669 = vrot.lane.b32.xlu1 %v1668_v60, %s1958_s7 }
  0x56   : > { %1664 = vrot.lane.b32.xlu0 %v1663_v61, %s1958_s7 }
  0x59   : > { %1679 = vrot.lane.b32.xlu1 %v1628_v46, %s1959_s29 }
  0x5a   : > { %1674 = vrot.lane.b32.xlu0 %v1623_v47, %s1959_s29 }
  0x5d   : > { %1689 = vrot.lane.b32.xlu1 %v1608_v40, %s1952_s11  ;;  %v1390_v40 = vld [vmem:[%s2059_s10 + $0xe2] sm:$0xff] }
  0x5e   : > { %1684 = vrot.lane.b32.xlu0 %v1603_v41, %s1952_s11 }
  0x61   : > { %1699 = vrot.lane.b32.xlu1 %v1698_v4, %s1959_s29 }
  0x62   : > { %1694 = vrot.lane.b32.xlu0 %v1693_v5, %s1959_s29 }
  0x65   : > { %1709 = vrot.lane.b32.xlu1 %v1668_v60, %s1952_s11 }
  0x66   : > { %1704 = vrot.lane.b32.xlu0 %v1663_v61, %s1952_s11  ;;  %s1960_s11 = smov [#allocation2]  }
  0x69   : > { %1719 = vrot.lane.b32.xlu1 %v1628_v46, %s1953_s20 }
  0x6a   : > { %1714 = vrot.lane.b32.xlu0 %v1623_v47, %s1953_s20 }
  0x6d   : > { %1729 = vrot.lane.b32.xlu1 %v1698_v4, %s1953_s20 }
  0x6e   : > { %1724 = vrot.lane.b32.xlu0 %v1693_v5, %s1953_s20 }
  0x71   : > { %1739 = vrot.lane.b32.xlu1 %v1648_v52, %s1954_s21 }
  0x72   : > { %1734 = vrot.lane.b32.xlu0 %v1643_v53, %s1954_s21 }
  0x75   : > { %1749 = vrot.lane.b32.xlu1 %v1748_v12, %s1954_s21 }
  0x76   : > { %1744 = vrot.lane.b32.xlu0 %v1743_v13, %s1954_s21  ;;  %s1860_s21 = sshll.u32 %s1960_s11, 4  ;;  %s1861_s21 = int_to_ptr.vmem [resolvable:$false] %s1860_s21 }
  0x79   : > { %1759 = vrot.lane.b32.xlu1 %v1668_v60, %s1955_s24 }
  0x7a   : > { %1754 = vrot.lane.b32.xlu0 %v1663_v61, %s1955_s24  ;;  %v188_v61 = vld [vmem:[%s2059_s10] sm:$0xff]  ;;  %s175_s10 = sand.u32 1, %s1926_s13  }
  0x7b   : > { %s2584_s9 = scalar_lea.sflag [#allocation3], %s175_s10 }
  0x7d   : > { %1769 = vrot.lane.b32.xlu1 %v1768_v17, %s1955_s24 }
  0x7e   : > { %1764 = vrot.lane.b32.xlu0 %v2073_v11, %s1955_s24  ;;  %s1287_s24 = sshll.u32 %s175_s10, 7 }
  0x81   : > { %1779 = vrot.lane.b32.xlu1 %v1698_v4, %s1956_s27 }
  0x82   : > { %1774 = vrot.lane.b32.xlu0 %v1693_v5, %s1956_s27 }
  0x85   : > { %1789 = vrot.lane.b32.xlu1 %v1788_v20, %s1956_s27 }
  0x86   : > { %1784 = vrot.lane.b32.xlu0 %v2081_v16, %s1956_s27  ;;  %s2551_s27 = scalar_lea.vmem [#allocation2], %s1287_s24  ;;  %s1862_s24 = scalar_lea.vmem %s1861_s21, 4096 }
  0x87   : > { %s1196_s16 = sshll.u32 %s2551_s27, 4  ;;  %s2577_s16 = int_to_ptr.vmem [resolvable:$true] %s1196_s16 }
  0x88   : > { %p1863_p2 = scmp.lt.s32.totalorder %s2577_s16, %s1861_s21 }
  0x89   : > { %1799 = vrot.lane.b32.xlu1 %v1748_v12, %s1957_s28 }
  0x8a   : > { %1794 = vrot.lane.b32.xlu0 %v1743_v13, %s1957_s28 }
  0x8d   : > { %1809 = vrot.lane.b32.xlu1 %v1808_v29, %s1957_s28 }
  0x8e   : > { %1804 = vrot.lane.b32.xlu0 %v2110_v28, %s1957_s28  ;;  %v1848_v28 = vpack.i.bf16 %v1390_v40, %v1389_v39  ;;  %s1410_s28 = sshll.u32 %s1934_s15, 4 }
  0x8f   : > { %s2563_s5 = sadd.s32 %s1410_s28, %s1406_s4 }
  0x90   : > { %s1407_s15 = sshll.u32 %s2563_s5, 7 }
  0x91   : > { %1819 = vrot.lane.b32.xlu1 %v1768_v17, %s1958_s7  ;;  %s2573_s8 = scalar_lea.hbm %s2640_s3, %s1407_s15 }
  0x92   : > { %1814 = vrot.lane.b32.xlu0 %v2073_v11, %s1958_s7 }
  0x93   : > { %v1545_v37 = vpop.permute.xlu1 %1544 }
  0x94   : > { %v1535_v38 = vpop.permute.xlu0 %1534  ;;  %v1546_v57 = vunpack.i.l.bf16 %v1545_v37  ;;  %v1547_v58 = vunpack.i.h.bf16 %v1545_v37 }
  0x95   : > { %1829 = vrot.lane.b32.xlu1 %v1828_v36, %s1958_s7  ;;  %v1537_v59 = vunpack.i.h.bf16 %v1535_v38  ;;  %v1536_v60 = vunpack.i.l.bf16 %v1535_v38 }
  0x96   : > { %1824 = vrot.lane.b32.xlu0 %v2070_v10, %s1958_s7  ;;  %v853_v5 = vsel %vm850_vm1, %v2101_v26, %v1546_v57  ;;  %v854_v13 = vsel %vm850_vm1, %v2104_v27, %v1547_v58 }
  0x97   : > { %v1550_v41 = vpop.permute.xlu1 %1549  ;;  %v851_v14 = vsel %vm850_vm1, %v188_v61, %v1536_v60  ;;  %v852_v15 = vsel %vm850_vm1, %v189_v62, %v1537_v59 }
  0x98   : > { %v1540_v42 = vpop.permute.xlu0 %1539  ;;  %v1552_v63 = vunpack.i.h.bf16 %v1550_v41  ;;  %v1551_v0 = vunpack.i.l.bf16 %v1550_v41 }
  0x99   : > { %1839 = vrot.lane.b32.xlu1 %v1788_v20, %s1959_s29  ;;  %v1541_v1 = vunpack.i.l.bf16 %v1540_v42  ;;  %v1542_v3 = vunpack.i.h.bf16 %v1540_v42 }
  0x9a   : > { %1834 = vrot.lane.b32.xlu0 %v2081_v16, %s1959_s29  ;;  %v861_v18 = vsel %vm850_vm1, %v2095_v24, %v1551_v0  ;;  %v862_v19 = vsel %vm850_vm1, %v2098_v25, %v1552_v63 }
  0x9b   : > { %v1560_v43 = vpop.permute.xlu1 %1559  ;;  %v859_v26 = vsel %vm850_vm1, %v2210_v8, %v1541_v1  ;;  %v860_v27 = vsel %vm850_vm1, %v2213_v9, %v1542_v3 }
  0x9c   : > { %v1555_v44 = vpop.permute.xlu0 %1554  ;;  %v1562_v6 = vunpack.i.h.bf16 %v1560_v43  ;;  %v1561_v7 = vunpack.i.l.bf16 %v1560_v43 }
  0x9d   : > { %1849 = vrot.lane.b32.xlu1 %v1848_v28, %s1959_s29  ;;  %v1556_v12 = vunpack.i.l.bf16 %v1555_v44  ;;  %v1557_v17 = vunpack.i.h.bf16 %v1555_v44 }
  0x9e   : > { %1844 = vrot.lane.b32.xlu0 %v2091_v22, %s1959_s29  ;;  %v876_v24 = vsel %vm867_vm2, %v859_v26, %v1561_v7  ;;  %v877_v25 = vsel %vm867_vm2, %v860_v27, %v1562_v6  ;;  %s1856_s29 = scalar_lea.vmem %s2577_s16, 2048 }
  0x9f   : > { %v1570_v11 = vpop.permute.xlu1 %1569  ;;  %v868_v36 = vsel %vm867_vm2, %v851_v14, %v1556_v12  ;;  %v869_v37 = vsel %vm867_vm2, %v852_v15, %v1557_v17  ;;  %p1857_p13 = scmp.ne.s32.totalorder %s2577_s16, %s1856_s29  ;;  %p1864_p4 = scmp.lt.s32.totalorder %s1862_s24, %s1856_s29 }
  0xa0   : > { %v2258_v45 = vpop.permute.xlu0 %1564  ;;  %v1571_v20 = vunpack.i.l.bf16 %v1570_v11  ;;  %v1572_v23 = vunpack.i.h.bf16 %v1570_v11 }
  0xa1   : > { %v1567_v29 = vunpack.i.h.bf16 %v2258_v45  ;;  %v1566_v34 = vunpack.i.l.bf16 %v2258_v45  ;;  %p1858_p0 = pnand %p1857_p13, %p2033_p3  ;;  %p1865_p5 = por %p1864_p4, %p1863_p2 }
  0xa2   : > { %v878_v40 = vsel %vm867_vm2, %v861_v18, %v1571_v20  ;;  %v879_v44 = vsel %vm867_vm2, %v862_v19, %v1572_v23 }
  0xa3   : > { %v2260_v10 = vpop.permute.xlu1 %1579  ;;  %v870_v11 = vsel %vm867_vm2, %v853_v5, %v1566_v34  ;;  %v871_v45 = vsel %vm867_vm2, %v854_v13, %v1567_v29  ;;  %p1859_p1 = pneg %p1858_p0 }
  0xa4   : > { %v2262_v46 = vpop.permute.xlu0 %1574  ;;  %v1581_v8 = vunpack.i.l.bf16 %v2260_v10  ;;  %v1582_v9 = vunpack.i.h.bf16 %v2260_v10 }
  0xa5   : > { %v1577_v38 = vunpack.i.h.bf16 %v2262_v46  ;;  %v1576_v39 = vunpack.i.l.bf16 %v2262_v46  ;;  %p1866_p6 = pnand %p1865_p5, %p1859_p1 }
  0xa6   : > { %v893_v57 = vsel %vm884_vm3, %v876_v24, %v1581_v8  ;;  %v894_v60 = vsel %vm884_vm3, %v877_v25, %v1582_v9 }
  0xa7   : > { %v2264_v47 = vpop.permute.xlu1 %1589  ;;  %v885_v61 = vsel %vm884_vm3, %v868_v36, %v1576_v39  ;;  %v886_v62 = vsel %vm884_vm3, %v869_v37, %v1577_v38 }
  0xa8   : > { %v2266_v52 = vpop.permute.xlu0 %1584  ;;  %v1592_v41 = vunpack.i.h.bf16 %v2264_v47  ;;  %v1591_v42 = vunpack.i.l.bf16 %v2264_v47 }
  0xa9   : > { %v1586_v28 = vunpack.i.l.bf16 %v2266_v52  ;;  %v1587_v10 = vunpack.i.h.bf16 %v2266_v52 }
  0xaa   : > { %v895_v52 = vsel %vm884_vm3, %v878_v40, %v1591_v42  ;;  %v896_v0 = vsel %vm884_vm3, %v879_v44, %v1592_v41 }
  0xab   : > { %v2268_v16 = vpop.permute.xlu1 %1599  ;;  %v2337_v1 = vsel %vm884_vm3, %v870_v11, %v1586_v28  ;;  %v888_v5 = vsel %vm884_vm3, %v871_v45, %v1587_v10 }
  0xac   : > { %v2270_v53 = vpop.permute.xlu0 %1594  ;;  %v1602_v58 = vunpack.i.h.bf16 %v2268_v16  ;;  %v1601_v47 = vunpack.i.l.bf16 %v2268_v16 }
  0xad   : > { %v1596_v59 = vunpack.i.l.bf16 %v2270_v53  ;;  %v1597_v63 = vunpack.i.h.bf16 %v2270_v53 }
  0xae   : > { %v910_v13 = vsel %vm901_vm4, %v893_v57, %v1601_v47  ;;  %v911_v14 = vsel %vm901_vm4, %v894_v60, %v1602_v58 }
  0xaf   : > { %v2272_v54 = vpop.permute.xlu1 %1609  ;;  %v902_v15 = vsel %vm901_vm4, %v885_v61, %v1596_v59  ;;  %v903_v18 = vsel %vm901_vm4, %v886_v62, %v1597_v63 }
  0xb0   : > { %v2274_v22 = vpop.permute.xlu0 %1604  ;;  %v1611_v16 = vunpack.i.l.bf16 %v2272_v54  ;;  %v1612_v19 = vunpack.i.h.bf16 %v2272_v54 }
  0xb1   : > { %v1607_v26 = vunpack.i.h.bf16 %v2274_v22  ;;  %v1606_v20 = vunpack.i.l.bf16 %v2274_v22 }
  0xb3   : > { %v2276_v55 = vpop.permute.xlu1 %1619 }
  0xb4   : > { %v2278_v56 = vpop.permute.xlu0 %1614  ;;  %v1622_v6 = vunpack.i.h.bf16 %v2276_v55  ;;  %v1621_v7 = vunpack.i.l.bf16 %v2276_v55  ;;  %v912_v55 = vsel %vm901_vm4, %v895_v52, %v1611_v16 }
  0xb5   : > { %v1616_v53 = vunpack.i.l.bf16 %v2278_v56  ;;  %v1617_v17 = vunpack.i.h.bf16 %v2278_v56 }
  0xb6   : > { %v927_v56 = vsel %vm918_vm5, %v910_v13, %v1621_v7  ;;  %v928_v24 = vsel %vm918_vm5, %v911_v14, %v1622_v6 }
  0xb7   : > { %v2282_v2 = vpop.permute.xlu1 %1629  ;;  %v919_v54 = vsel %vm918_vm5, %v902_v15, %v1616_v53  ;;  %v920_v36 = vsel %vm918_vm5, %v903_v18, %v1617_v17  ;;  %v913_v53 = vsel %vm901_vm4, %v896_v0, %v1612_v19  ;;  %v904_v17 = vsel %vm901_vm4, %v2337_v1, %v1606_v20 }
  0xb8   : > { %v2284_v4 = vpop.permute.xlu0 %1624  ;;  %v1632_v8 = vunpack.i.h.bf16 %v2282_v2  ;;  %v1631_v9 = vunpack.i.l.bf16 %v2282_v2 }
  0xb9   : > { %v1627_v38 = vunpack.i.h.bf16 %v2284_v4  ;;  %v1626_v41 = vunpack.i.l.bf16 %v2284_v4 }
  0xba   : > { %v929_v0 = vsel %vm918_vm5, %v912_v55, %v1631_v9  ;;  %v930_v19 = vsel %vm918_vm5, %v913_v53, %v1632_v8 }
  0xbb   : > { %v2298_v21 = vpop.permute.xlu1 %1639  ;;  %v921_v1 = vsel %vm918_vm5, %v904_v17, %v1626_v41 }
  0xbc   : > { %v2304_v35 = vpop.permute.xlu0 %1634  ;;  %v1642_v27 = vunpack.i.h.bf16 %v2298_v21  ;;  %v1641_v23 = vunpack.i.l.bf16 %v2298_v21 }
  0xbd   : > { %v1636_v29 = vunpack.i.l.bf16 %v2304_v35  ;;  %v1637_v25 = vunpack.i.h.bf16 %v2304_v35 }
  0xbe   : > { %v944_v42 = vsel %vm935_vm6, %v927_v56, %v1641_v23  ;;  %v945_v35 = vsel %vm935_vm6, %v928_v24, %v1642_v27 }
  0xbf   : > { %v2318_v43 = vpop.permute.xlu1 %1649  ;;  %v936_v28 = vsel %vm935_vm6, %v919_v54, %v1636_v29  ;;  %v937_v11 = vsel %vm935_vm6, %v920_v36, %v1637_v25 }
  0xc0   : > { %v2324_v46 = vpop.permute.xlu0 %1644  ;;  %v1652_v45 = vunpack.i.h.bf16 %v2318_v43  ;;  %v1651_v52 = vunpack.i.l.bf16 %v2318_v43  ;;  %v905_v43 = vsel %vm901_vm4, %v888_v5, %v1607_v26 }
  0xc1   : > { %v1646_v13 = vunpack.i.l.bf16 %v2324_v46  ;;  %v922_v5 = vsel %vm918_vm5, %v905_v43, %v1627_v38 }
  0xc2   : > { %v946_v26 = vsel %vm935_vm6, %v929_v0, %v1651_v52  ;;  %v947_v20 = vsel %vm935_vm6, %v930_v19, %v1652_v45 }
  0xc3   : > { %v1660_v3 = vpop.permute.xlu1 %1659 }
  0xc4   : > { %v1655_v12 = vpop.permute.xlu0 %1654  ;;  %v1662_v37 = vunpack.i.h.bf16 %v1660_v3  ;;  %v1661_v21 = vunpack.i.l.bf16 %v1660_v3 }
  0xc5   : > { %v1657_v39 = vunpack.i.h.bf16 %v1655_v12  ;;  %v1656_v40 = vunpack.i.l.bf16 %v1655_v12  ;;  %v1647_v12 = vunpack.i.h.bf16 %v2324_v46 }
  0xc6   : > { %v961_v59 = vsel %vm952_vm7, %v944_v42, %v1661_v21  ;;  %v962_v4 = vsel %vm952_vm7, %v945_v35, %v1662_v37 }
  0xc7   : > { %v2356_v34 = vpop.permute.xlu1 %1669  ;;  %v953_v60 = vsel %vm952_vm7, %v936_v28, %v1656_v40  ;;  %v954_v61 = vsel %vm952_vm7, %v937_v11, %v1657_v39  ;;  %v939_v55 = vsel %vm935_vm6, %v922_v5, %v1647_v12 }
  0xc8   : > { %v2362_v22 = vpop.permute.xlu0 %1664  ;;  %v1672_v18 = vunpack.i.h.bf16 %v2356_v34  ;;  %v1671_v27 = vunpack.i.l.bf16 %v2356_v34  ;;  %v938_v34 = vsel %vm935_vm6, %v921_v1, %v1646_v13 }
  0xc9   : > { %v1667_v46 = vunpack.i.h.bf16 %v2362_v22  ;;  %v1666_v23 = vunpack.i.l.bf16 %v2362_v22 }
  0xca   : > { %v963_v25 = vsel %vm952_vm7, %v946_v26, %v1671_v27  ;;  %v964_v22 = vsel %vm952_vm7, %v947_v20, %v1672_v18 }
  0xcb   : > { %v1680_v44 = vpop.permute.xlu1 %1679  ;;  %v955_v37 = vsel %vm952_vm7, %v938_v34, %v1666_v23  ;;  %v956_v21 = vsel %vm952_vm7, %v939_v55, %v1667_v46 }
  0xcc   : > { %v1682_v10 = vunpack.i.h.bf16 %v1680_v44  ;;  %v1681_v57 = vunpack.i.l.bf16 %v1680_v44  ;;  %v1675_v2 = vpop.permute.xlu0 %1674 }
  0xcd   : > { %v1677_v58 = vunpack.i.h.bf16 %v1675_v2  ;;  %v1676_v47 = vunpack.i.l.bf16 %v1675_v2 }
  0xce   : > { %v978_v62 = vsel %vm969_vm8, %v961_v59, %v1681_v57  ;;  %v979_v63 = vsel %vm969_vm8, %v962_v4, %v1682_v10 }
  0xcf   : > { %v2381_v16 = vpop.permute.xlu1 %1689  ;;  %v970_v3 = vsel %vm969_vm8, %v953_v60, %v1676_v47  ;;  %v971_v6 = vsel %vm969_vm8, %v954_v61, %v1677_v58  ;;  %v990_v7 = vpack.c.bf16 %v979_v63, %v978_v62 }
  0xd0   : > { %v2388_v14 = vpop.permute.xlu0 %1684  ;;  %v986_v15 = vpack.c.bf16 %v971_v6, %v970_v3  ;;  %v1692_v61 = vunpack.i.h.bf16 %v2381_v16  ;;  %v1691_v62 = vunpack.i.l.bf16 %v2381_v16 }
  0xd1   : > { %1436 = vmatprep.mubr.msk.bf16.mxu1 %vm1021_vm9, %v990_v7  ;;  %v1687_v52 = vunpack.i.h.bf16 %v2388_v14  ;;  %v1686_v3 = vunpack.i.l.bf16 %v2388_v14 }
  0xd2   : > { %1428 = vmatprep.mubr.msk.bf16.mxu0 %vm1021_vm9, %v986_v15  ;;  %v863_v7 = vsel %vm850_vm1, %v2116_v30, %v1691_v62  ;;  %v864_v53 = vsel %vm850_vm1, %v2119_v31, %v1692_v61 }
  0xd3   : > { %v1700_v29 = vpop.permute.xlu1 %1699  ;;  %v855_v27 = vsel %vm850_vm1, %v2122_v32, %v1686_v3  ;;  %v856_v14 = vsel %vm850_vm1, %v2125_v33, %v1687_v52 }
  0xd4   : > { %v1702_v56 = vunpack.i.h.bf16 %v1700_v29  ;;  %v1701_v24 = vunpack.i.l.bf16 %v1700_v29  ;;  %v1695_v54 = vpop.permute.xlu0 %1694 }
  0xd5   : > { %v1697_v36 = vunpack.i.h.bf16 %v1695_v54  ;;  %v1696_v8 = vunpack.i.l.bf16 %v1695_v54 }
  0xd6   : > { %v980_v9 = vsel %vm969_vm8, %v963_v25, %v1701_v24  ;;  %v981_v38 = vsel %vm969_vm8, %v964_v22, %v1702_v56 }
  0xd7   : > { %v991_v39 = vpack.c.bf16 %v981_v38, %v980_v9  ;;  %v972_v40 = vsel %vm969_vm8, %v955_v37, %v1696_v8  ;;  %v973_v41 = vsel %vm969_vm8, %v956_v21, %v1697_v36  ;;  %v1710_v42 = vpop.permute.xlu1 %1709 }
  0xd8   : > { %v987_v35 = vpack.c.bf16 %v973_v41, %v972_v40  ;;  %v1705_v28 = vpop.permute.xlu0 %1704  ;;  %v1712_v12 = vunpack.i.h.bf16 %v1710_v42  ;;  %v1711_v13 = vunpack.i.l.bf16 %v1710_v42 }
  0xd9   : > { %1437 = vmatmul.mubr.msk.bf16.vlgmr.msra.gmra.mrb[0].mxu1 %vm1021_vm9, %v991_v39  ;;  %v1707_v17 = vunpack.i.h.bf16 %v1705_v28  ;;  %v1706_v16 = vunpack.i.l.bf16 %v1705_v28 }
  0xda   : > { %1429 = vmatmul.mubr.msk.bf16.vlgmr.msra.gmra.mrb[0].mxu0 %vm1021_vm9, %v987_v35  ;;  %v865_v5 = vsel %vm850_vm1, %v2155_v48, %v1711_v13  ;;  %v866_v26 = vsel %vm850_vm1, %v2158_v49, %v1712_v12 }
  0xdb   : > { %v1720_v44 = vpop.permute.xlu1 %1719  ;;  %v857_v33 = vsel %vm850_vm1, %v2161_v50, %v1706_v16  ;;  %v858_v34 = vsel %vm850_vm1, %v2164_v51, %v1707_v17 }
  0xdc   : > { %v1715_v11 = vpop.permute.xlu0 %1714  ;;  %v1722_v43 = vunpack.i.h.bf16 %v1720_v44  ;;  %v1721_v18 = vunpack.i.l.bf16 %v1720_v44 }
  0xdd   : > { %v1717_v0 = vunpack.i.h.bf16 %v1715_v11  ;;  %v1716_v19 = vunpack.i.l.bf16 %v1715_v11 }
  0xde   : > { %v880_v55 = vsel %vm867_vm2, %v863_v7, %v1721_v18  ;;  %v881_v56 = vsel %vm867_vm2, %v864_v53, %v1722_v43 }
  0xdf   : > { %v1730_v45 = vpop.permute.xlu1 %1729  ;;  %v872_v24 = vsel %vm867_vm2, %v855_v27, %v1716_v19  ;;  %v873_v48 = vsel %vm867_vm2, %v856_v14, %v1717_v0 }
  0xe0   : > { %v1725_v10 = vpop.permute.xlu0 %1724  ;;  %v1732_v30 = vunpack.i.h.bf16 %v1730_v45  ;;  %v1731_v46 = vunpack.i.l.bf16 %v1730_v45 }
  0xe1   : > { %v1727_v23 = vunpack.i.h.bf16 %v1725_v10  ;;  %v1726_v31 = vunpack.i.l.bf16 %v1725_v10 }
  0xe2   : > { %v882_v25 = vsel %vm867_vm2, %v865_v5, %v1731_v46  ;;  %v883_v22 = vsel %vm867_vm2, %v866_v26, %v1732_v30 }
  0xe3   : > { %v1740_v57 = vpop.permute.xlu1 %1739  ;;  %v874_v36 = vsel %vm867_vm2, %v857_v33, %v1726_v31  ;;  %v875_v50 = vsel %vm867_vm2, %v858_v34, %v1727_v23 }
  0xe4   : > { %v1735_v2 = vpop.permute.xlu0 %1734  ;;  %v1742_v20 = vunpack.i.h.bf16 %v1740_v57  ;;  %v1741_v29 = vunpack.i.l.bf16 %v1740_v57 }
  0xe5   : > { %v1737_v54 = vunpack.i.h.bf16 %v1735_v2  ;;  %v1736_v49 = vunpack.i.l.bf16 %v1735_v2 }
  0xe6   : > { %v897_v51 = vsel %vm884_vm3, %v880_v55, %v1741_v29  ;;  %v898_v37 = vsel %vm884_vm3, %v881_v56, %v1742_v20 }
  0xe7   : > { %v2417_v58 = vpop.permute.xlu1 %1749  ;;  %v889_v35 = vsel %vm884_vm3, %v872_v24, %v1736_v49  ;;  %v890_v28 = vsel %vm884_vm3, %v873_v48, %v1737_v54 }
  0xe8   : > { %v2419_v47 = vpop.permute.xlu0 %1744  ;;  %v1752_v21 = vunpack.i.h.bf16 %v2417_v58  ;;  %v1751_v9 = vunpack.i.l.bf16 %v2417_v58 }
  0xe9   : > { %v1747_v39 = vunpack.i.h.bf16 %v2419_v47  ;;  %v1746_v40 = vunpack.i.l.bf16 %v2419_v47 }
  0xea   : > { %v899_v47 = vsel %vm884_vm3, %v882_v25, %v1751_v9 }
  0xeb   : > { %v2421_v59 = vpop.permute.xlu1 %1759  ;;  %v892_v3 = vsel %vm884_vm3, %v875_v50, %v1747_v39 }
  0xec   : > { %v2423_v4 = vpop.permute.xlu0 %1754  ;;  %v1762_v41 = vunpack.i.h.bf16 %v2421_v59  ;;  %v1761_v42 = vunpack.i.l.bf16 %v2421_v59  ;;  %v900_v59 = vsel %vm884_vm3, %v883_v22, %v1752_v21 }
  0xed   : > { %v1757_v44 = vunpack.i.h.bf16 %v2423_v4  ;;  %v1756_v11 = vunpack.i.l.bf16 %v2423_v4  ;;  %v891_v4 = vsel %vm884_vm3, %v874_v36, %v1746_v40 }
  0xee   : > { %v915_v7 = vsel %vm901_vm4, %v898_v37, %v1762_v41 }
  0xef   : > { %v2425_v60 = vpop.permute.xlu1 %1769  ;;  %v907_v53 = vsel %vm901_vm4, %v890_v28, %v1757_v44 }
  0xf0   : > { %v2429_v63 = vpop.permute.xlu0 %1764  ;;  %v1772_v45 = vunpack.i.h.bf16 %v2425_v60  ;;  %v1771_v10 = vunpack.i.l.bf16 %v2425_v60  ;;  %v914_v60 = vsel %vm901_vm4, %v897_v51, %v1761_v42 }
  0xf1   : > { %v1767_v57 = vunpack.i.h.bf16 %v2429_v63  ;;  %v1766_v2 = vunpack.i.l.bf16 %v2429_v63  ;;  %v906_v63 = vsel %vm901_vm4, %v889_v35, %v1756_v11 }
  0xf2   : > { %v917_v17 = vsel %vm901_vm4, %v900_v59, %v1772_v45 }
  0xf3   : > { %v2433_v6 = vpop.permute.xlu1 %1779  ;;  %v908_v16 = vsel %vm901_vm4, %v891_v4, %v1766_v2  ;;  %v909_v43 = vsel %vm901_vm4, %v892_v3, %v1767_v57 }
  0xf4   : > { %v2439_v15 = vpop.permute.xlu0 %1774  ;;  %v1782_v61 = vunpack.i.h.bf16 %v2433_v6  ;;  %v1781_v62 = vunpack.i.l.bf16 %v2433_v6  ;;  %v916_v6 = vsel %vm901_vm4, %v899_v47, %v1771_v10 }
  0xf5   : > { %v1777_v12 = vunpack.i.h.bf16 %v2439_v15  ;;  %v1776_v13 = vunpack.i.l.bf16 %v2439_v15 }
  0xf6   : > { %v931_v27 = vsel %vm918_vm5, %v914_v60, %v1781_v62  ;;  %v932_v14 = vsel %vm918_vm5, %v915_v7, %v1782_v61 }
  0xf7   : > { %v2445_v1 = vpop.permute.xlu1 %1789  ;;  %v923_v5 = vsel %vm918_vm5, %v906_v63, %v1776_v13  ;;  %v924_v26 = vsel %vm918_vm5, %v907_v53, %v1777_v12 }
  0xf8   : > { %v2451_v32 = vpop.permute.xlu0 %1784  ;;  %v1792_v0 = vunpack.i.h.bf16 %v2445_v1  ;;  %v1791_v19 = vunpack.i.l.bf16 %v2445_v1 }
  0xf9   : > { %v1787_v15 = vunpack.i.h.bf16 %v2451_v32  ;;  %v1786_v46 = vunpack.i.l.bf16 %v2451_v32 }
  0xfa   : > { %v933_v24 = vsel %vm918_vm5, %v916_v6, %v1791_v19  ;;  %v934_v48 = vsel %vm918_vm5, %v917_v17, %v1792_v0 }
  0xfb   : > { %v2465_v8 = vpop.permute.xlu1 %1799  ;;  %v925_v25 = vsel %vm918_vm5, %v908_v16, %v1786_v46  ;;  %v926_v22 = vsel %vm918_vm5, %v909_v43, %v1787_v15 }
  0xfc   : > { %v1795_v38 = vpop.permute.xlu0 %1794  ;;  %v1802_v23 = vunpack.i.h.bf16 %v2465_v8  ;;  %v1801_v31 = vunpack.i.l.bf16 %v2465_v8 }
  0xfd   : > { %v1797_v20 = vunpack.i.h.bf16 %v1795_v38  ;;  %v1796_v29 = vunpack.i.l.bf16 %v1795_v38 }
  0xfe   : > { %v948_v36 = vsel %vm935_vm6, %v931_v27, %v1801_v31  ;;  %v949_v50 = vsel %vm935_vm6, %v932_v14, %v1802_v23  ;;  %v1391_v23 = vld [vmem:[%s2639_s2] ss:$0 sm:$0xff] }
  0xff   : > { %v1810_v58 = vpop.permute.xlu1 %1809  ;;  %v940_v8 = vsel %vm935_vm6, %v923_v5, %v1796_v29  ;;  %v941_v51 = vsel %vm935_vm6, %v924_v26, %v1797_v20 }
 0x100   : > { %v2487_v52 = vpop.permute.xlu0 %1804  ;;  %v1812_v33 = vunpack.i.h.bf16 %v1810_v58  ;;  %v1811_v34 = vunpack.i.l.bf16 %v1810_v58 }
 0x101   : > { %v1807_v37 = vunpack.i.h.bf16 %v2487_v52  ;;  %v1806_v21 = vunpack.i.l.bf16 %v2487_v52 }
 0x102   : > { %v950_v9 = vsel %vm935_vm6, %v933_v24, %v1811_v34  ;;  %v951_v38 = vsel %vm935_vm6, %v934_v48, %v1812_v33 }
 0x103   : > { %v1820_v18 = vpop.permute.xlu1 %1819  ;;  %v942_v62 = vsel %vm935_vm6, %v925_v25, %v1806_v21  ;;  %v943_v7 = vsel %vm935_vm6, %v926_v22, %v1807_v37 }
 0x104   : > { %v1815_v30 = vpop.permute.xlu0 %1814  ;;  %v1822_v55 = vunpack.i.h.bf16 %v1820_v18  ;;  %v1821_v56 = vunpack.i.l.bf16 %v1820_v18 }
 0x105   : > { %v1817_v32 = vunpack.i.h.bf16 %v1815_v30  ;;  %v1816_v54 = vunpack.i.l.bf16 %v1815_v30 }
 0x106   : > { %v965_v39 = vsel %vm952_vm7, %v948_v36, %v1821_v56  ;;  %v966_v40 = vsel %vm952_vm7, %v949_v50, %v1822_v55 }
 0x107   : > { %v1830_v1 = vpop.permute.xlu1 %1829  ;;  %v957_v42 = vsel %vm952_vm7, %v940_v8, %v1816_v54  ;;  %v958_v35 = vsel %vm952_vm7, %v941_v51, %v1817_v32 }
 0x108   : > { %v1825_v49 = vpop.permute.xlu0 %1824  ;;  %v1832_v45 = vunpack.i.h.bf16 %v1830_v1  ;;  %v1831_v10 = vunpack.i.l.bf16 %v1830_v1 }
 0x109   : > { %v1827_v58 = vunpack.i.h.bf16 %v1825_v49  ;;  %v1826_v47 = vunpack.i.l.bf16 %v1825_v49 }
 0x10a   : > { %v967_v6 = vsel %vm952_vm7, %v950_v9, %v1831_v10  ;;  %v968_v17 = vsel %vm952_vm7, %v951_v38, %v1832_v45 }
 0x10b   : > { %v1840_v41 = vpop.permute.xlu1 %1839  ;;  %v959_v18 = vsel %vm952_vm7, %v942_v62, %v1826_v47  ;;  %v960_v27 = vsel %vm952_vm7, %v943_v7, %v1827_v58 }
 0x10c   : > { %v1842_v28 = vunpack.i.h.bf16 %v1840_v41  ;;  %v1841_v44 = vunpack.i.l.bf16 %v1840_v41  ;;  %v1835_v11 = vpop.permute.xlu0 %1834 }
 0x10d   : > { %v1837_v57 = vunpack.i.h.bf16 %v1835_v11  ;;  %v1836_v2 = vunpack.i.l.bf16 %v1835_v11 }
 0x10e   : > { %v982_v59 = vsel %vm969_vm8, %v965_v39, %v1841_v44  ;;  %v983_v61 = vsel %vm969_vm8, %v966_v40, %v1842_v28 }
 0x10f   : > { %v992_v52 = vpack.c.bf16 %v983_v61, %v982_v59  ;;  %v974_v4 = vsel %vm969_vm8, %v957_v42, %v1836_v2  ;;  %v975_v3 = vsel %vm969_vm8, %v958_v35, %v1837_v57  ;;  %v1850_v60 = vpop.permute.xlu1 %1849 }
 0x110   : > { %v988_v63 = vpack.c.bf16 %v975_v3, %v974_v4  ;;  %v1852_v53 = vunpack.i.h.bf16 %v1850_v60  ;;  %v1851_v12 = vunpack.i.l.bf16 %v1850_v60  ;;  %v1845_v13 = vpop.permute.xlu0 %1844 }
 0x111   : > { %v1847_v16 = vunpack.i.h.bf16 %v1845_v13  ;;  %v1846_v43 = vunpack.i.l.bf16 %v1845_v13  ;;  %1440 = vmatprep.mubr.msk.bf16.mxu1 %vm1021_vm9, %v992_v52 }
 0x112   : > { %v984_v14 = vsel %vm969_vm8, %v967_v6, %v1851_v12  ;;  %v985_v0 = vsel %vm969_vm8, %v968_v17, %v1852_v53  ;;  %1432 = vmatprep.mubr.msk.bf16.mxu0 %vm1021_vm9, %v988_v63 }
 0x113   : > { %v993_v19 = vpack.c.bf16 %v985_v0, %v984_v14  ;;  %v976_v30 = vsel %vm969_vm8, %v959_v18, %v1846_v43  ;;  %v977_v15 = vsel %vm969_vm8, %v960_v27, %v1847_v16 }
 0x114   : > { %v989_v46 = vpack.c.bf16 %v977_v15, %v976_v30 }
 0x115   : > { %1441 = vmatmul.mubr.msk.bf16.gmra.mrb[4].mxu1 %vm1021_vm9, %v993_v19 }
 0x116   : > { %1433 = vmatmul.mubr.msk.bf16.gmra.mrb[4].mxu0 %vm1021_vm9, %v989_v46 }
 0x1ac   : > { %v1438_v31 = vpop.f32.mrb[0].mxu1 }
 0x1ad   : > { %v1430_v5 = vpop.f32.mrb[0].mxu0  ;;  %v1125_v26 = vadd.f32 %v1438_v31, %v1391_v23  ;;  %v1116_v20 = vpop.f32.mrb[1].mxu1 }
 0x1ae   : > { %v1093_v29 = vadd.f32 %v1430_v5, %v1391_v23  ;;  %v1084_v33 = vpop.f32.mrb[1].mxu0  ;;  %v1117_v34 = vadd.f32 %v1391_v23, %v1116_v20  ;;  %v1439_v55 = vpop.f32.mrb[2].mxu1 }
 0x1af   : > { %v1157_v56 = vmax.f32 %v1125_v26, 0.0  ;;  %v1085_v1 = vadd.f32 %v1391_v23, %v1084_v33  ;;  %v1431_v24 = vpop.f32.mrb[2].mxu0  ;;  %v1128_v48 = vadd.f32 %v1439_v55, %v1391_v23  ;;  %v1119_v32 = vpop.f32.mrb[3].mxu1 }
 0x1b0   : > { %v1149_v54 = vmax.f32 %v1093_v29, 0.0  ;;  %v1155_v49 = vmax.f32 %v1117_v34, 0.0  ;;  %v1096_v25 = vadd.f32 %v1431_v24, %v1391_v23  ;;  %v1087_v22 = vpop.f32.mrb[3].mxu0  ;;  %v1120_v36 = vadd.f32 %v1391_v23, %v1119_v32 }
 0x1b1   : > { %1173 = vst [vmem:[%s2551_s27 + $0x50] sm:$0xff] %v1157_v56  ;;  %v1147_v50 = vmax.f32 %v1085_v1, 0.0  ;;  %v1158_v8 = vmax.f32 %v1128_v48, 0.0  ;;  %v1088_v51 = vadd.f32 %v1391_v23, %v1087_v22 }
 0x1b2   : > { %1165 = vst [vmem:[%s2551_s27 + $0x10] sm:$0xff] %v1149_v54  ;;  %1171 = vst [vmem:[%s2551_s27 + $0x40] sm:$0xff] %v1155_v49  ;;  %v1150_v37 = vmax.f32 %v1096_v25, 0.0  ;;  %v1156_v21 = vmax.f32 %v1120_v36, 0.0 }
 0x1b3   : > { %1163 = vst [vmem:[%s2551_s27] sm:$0xff] %v1147_v50  ;;  %1174 = vst [vmem:[%s2551_s27 + $0x58] sm:$0xff] %v1158_v8  ;;  %v1148_v9 = vmax.f32 %v1088_v51, 0.0 }
 0x1b4   : > { %1166 = vst [vmem:[%s2551_s27 + $0x18] sm:$0xff] %v1150_v37  ;;  %1172 = vst [vmem:[%s2551_s27 + $0x48] sm:$0xff] %v1156_v21 }
 0x1b5   : > { %1164 = vst [vmem:[%s2551_s27 + $0x8] sm:$0xff] %v1148_v9 }
 0x1e8   : > { %v1442_v38 = vpop.f32.mrb[4].mxu1 }
 0x1e9   : > { %v1434_v39 = vpop.f32.mrb[4].mxu0  ;;  %v1141_v40 = vadd.f32 %v1442_v38, %v1391_v23  ;;  %v1132_v41 = vpop.f32.mrb[5].mxu1 }
 0x1ea   : > { %v1109_v42 = vadd.f32 %v1434_v39, %v1391_v23  ;;  %v1100_v35 = vpop.f32.mrb[5].mxu0  ;;  %v1133_v28 = vadd.f32 %v1391_v23, %v1132_v41  ;;  %v1443_v44 = vpop.f32.mrb[6].mxu1 }
 0x1eb   : > { %v1161_v11 = vmax.f32 %v1141_v40, 0.0  ;;  %v1101_v45 = vadd.f32 %v1391_v23, %v1100_v35  ;;  %v1435_v10 = vpop.f32.mrb[6].mxu0  ;;  %v1144_v57 = vadd.f32 %v1443_v44, %v1391_v23  ;;  %v1135_v2 = vpop.f32.mrb[7].mxu1 }
 0x1ec   : > { %v1153_v58 = vmax.f32 %v1109_v42, 0.0  ;;  %v1159_v47 = vmax.f32 %v1133_v28, 0.0  ;;  %v1112_v59 = vadd.f32 %v1435_v10, %v1391_v23  ;;  %v1103_v61 = vpop.f32.mrb[7].mxu0  ;;  %v1136_v62 = vadd.f32 %v1391_v23, %v1135_v2 }
 0x1ed   : > { %1177 = vst [vmem:[%s2551_s27 + $0x70] sm:$0xff] %v1161_v11  ;;  %v1151_v52 = vmax.f32 %v1101_v45, 0.0  ;;  %v1162_v4 = vmax.f32 %v1144_v57, 0.0  ;;  %v1104_v3 = vadd.f32 %v1391_v23, %v1103_v61 }
 0x1ee   : > { %1169 = vst [vmem:[%s2551_s27 + $0x30] sm:$0xff] %v1153_v58  ;;  %1175 = vst [vmem:[%s2551_s27 + $0x60] sm:$0xff] %v1159_v47  ;;  %v1154_v60 = vmax.f32 %v1112_v59, 0.0  ;;  %v1160_v7 = vmax.f32 %v1136_v62, 0.0 }
 0x1ef   : > { %1167 = vst [vmem:[%s2551_s27 + $0x20] sm:$0xff] %v1151_v52  ;;  %1178 = vst [vmem:[%s2551_s27 + $0x78] sm:$0xff] %v1162_v4  ;;  %v1152_v63 = vmax.f32 %v1104_v3, 0.0 }
 0x1f0   : > { %1170 = vst [vmem:[%s2551_s27 + $0x38] sm:$0xff] %v1154_v60  ;;  %1176 = vst [vmem:[%s2551_s27 + $0x68] sm:$0xff] %v1160_v7 }
 0x1f1   : > { %1168 = vst [vmem:[%s2551_s27 + $0x28] sm:$0xff] %v1152_v63 }
 0x1f2   : > { %1869 = shalt.err (!%p1866_p6)
}
 0x1f3   : > { %s1870_s10 = scalar_lea.hbm %s2573_s8, 2048  ;;  %s1874_s4 = scalar_lea.hbm %s2640_s3, 8192 }
 0x1f4   : > { %p1871_p7 = scmp.ne.s32.totalorder %s2573_s8, %s1870_s10  ;;  %p1875_p11 = scmp.lt.u32.totalorder %s2573_s8, %s2640_s3 }
 0x1f5   : > { %p1876_p12 = scmp.lt.u32.totalorder %s1874_s4, %s1870_s10  ;;  %p1878_p0 = scmp.lt.u32.totalorder %s1870_s10, %s2573_s8 }
 0x1f6   : > { %p1872_p9 = pnand %p1871_p7, %p2033_p3 }
 0x1f7   : > { %p1877_p13 = por %p1876_p12, %p1875_p11 }
 0x1f8   : > { %p1873_p10 = pneg %p1872_p9 }
 0x1f9   : > { %p1879_p1 = por %p1878_p0, %p1877_p13 }
 0x1fb   : > { %p1880_p2 = pnand %p1879_p1, %p1873_p10 }
 0x1fd   : > { %1883 = shalt.err (!%p1880_p2)
}
 0x1fe   : > { %s1961_s6 = smov 128  }
 0x1ff   : > { %1453 = dma.vmem_to_hbm [thread:$0]  (%p2033_p3), %s2577_s16, 2048, %s2573_s8, %s2584_s9, %s1961_s6, %s1961_s6, %s1953_s20  }
 0x200 PF: > { %p1459_p4 = scmp.ge.s32.totalorder %s1950_s19, 2  ;;  %s1211_s7 = sand.u32 1, %s1922_s12  }
 0x201   : > { %s1212_s29 = scalar_lea.sflag [#allocation3], %s1211_s7 }
 0x202   : > { %p1456_p5 = pnand %p1459_p4, %p2042_p8 }
 0x204   : > { %1917 = dma.done.wait (!%p1456_p5), %s1212_s29, 2048  }
 0x205   : > { %1919 = vsyncadd (!%p1456_p5), %s1212_s29, 4294965248  ;;  %s16_s19 = sadd.s32 1, %s1950_s19   ;;  %s2643_s12 = smov %s1926_s13 }
 0x206   : > { %p13_p6 = scmp.ge.s32.totalorder %s16_s19, 6   ;;  %s2644_s13 = smov %s1930_s14 }
 0x207   : > { %s2645_s14 = smov %s2051_s30  ;;  %s2646_s15 = smov %s1942_s17 }
 0x208   : > { %s2647_s16 = smov %s1946_s18  ;;  %s2648_s17 = smov %s2651_s22 }
 0x209   : > { %s2649_s18 = smov %s2655_s23  ;;  %15 = sbr.rel (!%p13_p6) target bundleno = 5 (0x5), region = 70 }
 0x210   :  { %1217 = vsyncpa [#allocation3], 1 }
 0x211   :  { %1219 = vsyncpa [#allocation3 + $0x1], 1 }

</bundles_post_ra>
